<compile_context>
chip_gen: v7x
topology: tpu7x:2x2x1
jax: 0.10.0
libtpu: 0.0.40
codegen_flags: <defaults>
</compile_context>

<pallas_src>
from typing import NamedTuple

import jax
import jax.numpy as jnp
from jax.experimental import pallas as pl
from jax.experimental.pallas import tpu as pltpu

LANE = 128
SUBLANE = 8


def _round_up(x, m):
    return ((x + m - 1) // m) * m


class PolicyParams(NamedTuple):
    """Padded / cast / standardizer-folded parameters (built once at load)."""
    w1: jax.Array   # (D,  Hp)  matmul dtype, standardizer folded in
    b1: jax.Array   # (1,  Hp)  f32, standardizer folded in
    w2: jax.Array   # (Hp, Hp)  matmul dtype
    b2: jax.Array   # (1,  Hp)  f32
    wo: jax.Array   # (Hp, Ap)  matmul dtype
    bo: jax.Array   # (1,  Ap)  f32


def prepare_params(mean, meansq, w1, b1, w2, b2, wo, bo,
                   *, matmul_dtype=jnp.bfloat16):
    """One-time parameter preparation ("checkpoint load time").

    Folds the obs Standardizer into the first affine layer, zero-pads every
    weight/bias to 128-lane widths and casts weights to the MXU dtype.  None
    of this runs per inference call."""
    w1 = jnp.asarray(w1, jnp.float32)
    w2 = jnp.asarray(w2, jnp.float32)
    wo = jnp.asarray(wo, jnp.float32)
    D, H = w1.shape
    A = wo.shape[1]
    Hp = _round_up(H, LANE)
    Ap = _round_up(A, LANE)

    mean = jnp.asarray(mean, jnp.float32).reshape(1, D)
    meansq = jnp.asarray(meansq, jnp.float32).reshape(1, D)
    std = jnp.sqrt(jnp.maximum(0.0, meansq - mean * mean))
    inv_std = 1.0 / (std + 1e-6)

    # Fold: ((x - mean) * inv_std) @ W1 + b1 == x @ W1' + b1'
    w1f = w1 * inv_std.reshape(D, 1)
    b1f = jnp.asarray(b1, jnp.float32).reshape(1, H) - (mean * inv_std) @ w1

    def pad2(a, rows, cols, dtype):
        a = jnp.asarray(a, jnp.float32)
        return jnp.pad(a, ((0, rows - a.shape[0]),
                           (0, cols - a.shape[1]))).astype(dtype)

    params = PolicyParams(
        w1=pad2(w1f, D, Hp, matmul_dtype),
        b1=pad2(b1f, 1, Hp, jnp.float32),
        w2=pad2(w2, Hp, Hp, matmul_dtype),
        b2=pad2(jnp.asarray(b2, jnp.float32).reshape(1, H), 1, Hp, jnp.float32),
        wo=pad2(wo, Hp, Ap, matmul_dtype),
        bo=pad2(jnp.asarray(bo, jnp.float32).reshape(1, A), 1, Ap, jnp.float32),
    )
    return params, A


def _has_bf16_eup():
    """bf16 transcendentals exist on v6e/v7x; keep f32 tanh on <= v5."""
    try:
        kind = jax.devices()[0].device_kind.lower()
    except Exception:
        return True
    return not any(t in kind for t in ("v2", "v3", "v4", "v5"))


def _make_policy_kernel(bf16_tanh):
    def kernel(x_ref, w1_ref, b1_ref, w2_ref, b2_ref, wo_ref, bo_ref, out_ref):
        mm = w1_ref.dtype                       # matmul dtype (bf16 by default)

        # ---- layer 1 (Standardizer pre-folded into W1/b1) ----
        a1 = jnp.dot(x_ref[...].astype(mm), w1_ref[...],
                     preferred_element_type=jnp.float32) + b1_ref[...]
        if bf16_tanh:
            h1 = jnp.tanh(a1.astype(jnp.bfloat16))   # bf16 EUP (v6e/v7x)
        else:
            h1 = jnp.tanh(a1).astype(mm)             # f32 EUP (v5e)

        # ---- layer 2 ----
        a2 = jnp.dot(h1.astype(mm), w2_ref[...],
                     preferred_element_type=jnp.float32) + b2_ref[...]
        if bf16_tanh:
            h2 = jnp.tanh(a2.astype(jnp.bfloat16))
        else:
            h2 = jnp.tanh(a2).astype(mm)

        # ---- output affine (lane-dense store; bf16 slab halves writeback) ----
        out = jnp.dot(h2.astype(mm), wo_ref[...],
                      preferred_element_type=jnp.float32) + bo_ref[...]
        out_ref[...] = out.astype(out_ref.dtype)
    return kernel


def loaded_gaussian_policy_forward(obs, params, *, act_dim, tile_m=256,
                                   bf16_tanh=None, out_dtype=jnp.bfloat16):
    """Forward pass.  Parameters must come from `prepare_params` (padded,
    standardizer folded, VMEM-resident across the batch grid)."""
    if bf16_tanh is None:
        bf16_tanh = _has_bf16_eup()

    obs = jnp.asarray(obs, jnp.float32)
    squeeze = obs.ndim == 1                     # mirrors the module's squeeze(0)
    if squeeze:
        obs = obs[None, :]
    B, D = obs.shape

    Hp = params.w1.shape[1]
    Ap = params.wo.shape[1]

    # Batch tiling: big tiles (fills v6e/v7x 256-row MXU) but never collapse
    # below 2 grid steps for small batches, so v7x's two TensorCores both work.
    tm = _round_up(max(SUBLANE, min(int(tile_m), _round_up(B, SUBLANE))), SUBLANE)
    if B > SUBLANE and B < 2 * tm:
        tm = _round_up(pl.cdiv(B, 2), SUBLANE)

    const = lambda i: (0, 0)   # weights/biases: same block every step (resident)

    out = pl.pallas_call(
        _make_policy_kernel(bf16_tanh),
        out_shape=jax.ShapeDtypeStruct((B, Ap), out_dtype),
        grid=(pl.cdiv(B, tm),),
        in_specs=[
            pl.BlockSpec((tm, D), lambda i: (i, 0)),   # obs (streamed; ragged last tile)
            pl.BlockSpec((D, Hp), const),              # W1 (standardizer folded)
            pl.BlockSpec((1, Hp), const),              # b1
            pl.BlockSpec((Hp, Hp), const),             # W2
            pl.BlockSpec((1, Hp), const),              # b2
            pl.BlockSpec((Hp, Ap), const),             # Wout
            pl.BlockSpec((1, Ap), const),              # bout
        ],
        out_specs=pl.BlockSpec((tm, Ap), lambda i: (i, 0)),
        compiler_params=pltpu.CompilerParams(
            dimension_semantics=("parallel",),          # megacore / v7x 2xTC
            vmem_limit_bytes=32 * 1024 * 1024,          # footprint < 2 MiB anyway
        ),
    )(obs, params.w1, params.b1, params.w2, params.b2, params.wo, params.bo)

    out = out[:, :act_dim].astype(jnp.float32)
    return out[0] if squeeze else out


# ----------------------------- references / test -----------------------------

def _init_params(key, obs_dim, hidden, act_dim):
    ks = jax.random.split(key, 7)
    mean = jax.random.normal(ks[0], (1, obs_dim), jnp.float32) * 0.5
    # meansq >= mean^2 so std is well defined (as in a real Standardizer)
    meansq = mean * mean + jax.random.uniform(ks[1], (1, obs_dim), jnp.float32,
                                              minval=0.1, maxval=1.0)
    w1 = jax.random.normal(ks[2], (obs_dim, hidden), jnp.float32) * 0.1
    b1 = jax.random.normal(ks[3], (1, hidden), jnp.float32) * 0.1
    w2 = jax.random.normal(ks[4], (hidden, hidden), jnp.float32) * 0.1
    b2 = jax.random.normal(ks[5], (1, hidden), jnp.float32) * 0.1
    wo = jax.random.normal(ks[6], (hidden, act_dim), jnp.float32) * 0.1
    bo = jnp.zeros((1, act_dim), jnp.float32)
    return mean, meansq, w1, b1, w2, b2, wo, bo


def _reference_f32(obs, mean, meansq, w1, b1, w2, b2, wo, bo):
    """PyTorch-module semantics in pure f32 JAX."""
    std = jnp.sqrt(jnp.maximum(0.0, meansq - mean * mean))
    x = (obs - mean) / (std + 1e-6)
    h1 = jnp.tanh(x @ w1 + b1)
    h2 = jnp.tanh(h1 @ w2 + b2)
    return h2 @ wo + bo


def _reference_matched(obs, pp, act_dim, bf16_tanh, out_dtype):
    """Same fold / padding / precision path as the kernel, in plain JAX."""
    mm = pp.w1.dtype
    a1 = jnp.dot(obs.astype(mm), pp.w1, preferred_element_type=jnp.float32) + pp.b1
    h1 = jnp.tanh(a1.astype(jnp.bfloat16)) if bf16_tanh else jnp.tanh(a1).astype(mm)
    a2 = jnp.dot(h1.astype(mm), pp.w2, preferred_element_type=jnp.float32) + pp.b2
    h2 = jnp.tanh(a2.astype(jnp.bfloat16)) if bf16_tanh else jnp.tanh(a2).astype(mm)
    out = jnp.dot(h2.astype(mm), pp.wo, preferred_element_type=jnp.float32) + pp.bo
    return out.astype(out_dtype).astype(jnp.float32)[:, :act_dim]


if __name__ == "__main__":
    # Small policy dims, but enough batch rows to exercise the batch grid
    # (grid of 2 with a ragged, masked last tile).
    B, OBS_DIM, HIDDEN, ACT_DIM = 200, 16, 32, 8

    key = jax.random.PRNGKey(0)
    k_obs, k_params = jax.random.split(key)
    obs = jax.random.normal(k_obs, (B, OBS_DIM), jnp.float32)
    raw = _init_params(k_params, OBS_DIM, HIDDEN, ACT_DIM)

    # One-time "checkpoint load": fold standardizer, pad, cast.
    params, act_dim = prepare_params(*raw)
    bf16_tanh = _has_bf16_eup()

    forward = jax.jit(loaded_gaussian_policy_forward,
                      static_argnames=("act_dim", "tile_m", "bf16_tanh", "out_dtype"))
    out = forward(obs, params, act_dim=act_dim, tile_m=256, bf16_tanh=bf16_tanh)
    out = jax.block_until_ready(out)

    ref_matched = _reference_matched(obs, params, act_dim, bf16_tanh, jnp.bfloat16)
    ref_f32 = _reference_f32(obs, *raw)

    assert out.shape == (B, ACT_DIM)
    assert bool(jnp.all(jnp.isfinite(out)))
    # Same precision path -> tight tolerance.
    assert jnp.allclose(out, ref_matched, atol=1e-2, rtol=1e-2), \
        float(jnp.max(jnp.abs(out - ref_matched)))
    # Original module (f32) semantics -> bf16-path tolerance.
    assert jnp.allclose(out, ref_f32, atol=5e-2, rtol=5e-2), \
        float(jnp.max(jnp.abs(out - ref_f32)))

    print("KERNEL_OK")
</pallas_src>

<mosaic_0001>
module attributes {stable_mosaic.version = 11 : i64} {
  func.func @kernel(%arg0: i32, %arg1: memref<104x16xf32, #tpu.memory_space<vmem>>, %arg2: memref<16x128xbf16, #tpu.memory_space<vmem>>, %arg3: memref<1x128xf32, #tpu.memory_space<vmem>>, %arg4: memref<128x128xbf16, #tpu.memory_space<vmem>>, %arg5: memref<1x128xf32, #tpu.memory_space<vmem>>, %arg6: memref<128x128xbf16, #tpu.memory_space<vmem>>, %arg7: memref<1x128xf32, #tpu.memory_space<vmem>>, %arg8: memref<104x128xbf16, #tpu.memory_space<vmem>>) attributes {dimension_semantics = [#tpu.dimension_semantics<parallel>], iteration_bounds = array<i64: 2>, scalar_prefetch = 0 : i64, scratch_operands = 0 : i64, tpu.core_type = #tpu.core_type<tc>, window_params = [{transform_indices = @transform_0, window_bounds = array<i64: 104, 16>}, {pipeline_mode = #tpu.pipeline_mode<synchronous>, transform_indices = @transform_1, window_bounds = array<i64: 16, 128>}, {pipeline_mode = #tpu.pipeline_mode<synchronous>, transform_indices = @transform_2, window_bounds = array<i64: 1, 128>}, {pipeline_mode = #tpu.pipeline_mode<synchronous>, transform_indices = @transform_3, window_bounds = array<i64: 128, 128>}, {pipeline_mode = #tpu.pipeline_mode<synchronous>, transform_indices = @transform_4, window_bounds = array<i64: 1, 128>}, {pipeline_mode = #tpu.pipeline_mode<synchronous>, transform_indices = @transform_5, window_bounds = array<i64: 128, 128>}, {pipeline_mode = #tpu.pipeline_mode<synchronous>, transform_indices = @transform_6, window_bounds = array<i64: 1, 128>}, {transform_indices = @transform_7, window_bounds = array<i64: 104, 128>}]} {
    %c0 = arith.constant 0 : index
    %c0_0 = arith.constant 0 : index
    %0 = vector.load %arg1[%c0, %c0_0] : memref<104x16xf32, #tpu.memory_space<vmem>>, vector<104x16xf32>
    %1 = arith.truncf %0 : vector<104x16xf32> to vector<104x16xbf16>
    %c0_1 = arith.constant 0 : index
    %c0_2 = arith.constant 0 : index
    %2 = vector.load %arg2[%c0_1, %c0_2] : memref<16x128xbf16, #tpu.memory_space<vmem>>, vector<16x128xbf16>
    %cst = arith.constant dense<0.000000e+00> : vector<104x128xf32>
    %3 = tpu.matmul %1, %2, %cst {dimension_numbers = #tpu.dot_dimension_numbers<[1], [0], [0], [1], [0, 0, 1, 1], [], []>} : vector<104x16xbf16>, vector<16x128xbf16>, vector<104x128xf32> -> vector<104x128xf32>
    %c0_3 = arith.constant 0 : index
    %c0_4 = arith.constant 0 : index
    %4 = vector.load %arg3[%c0_3, %c0_4] : memref<1x128xf32, #tpu.memory_space<vmem>>, vector<1x128xf32>
    %5 = vector.broadcast %4 : vector<1x128xf32> to vector<104x128xf32>
    %6 = arith.addf %3, %5 : vector<104x128xf32>
    %7 = arith.truncf %6 : vector<104x128xf32> to vector<104x128xbf16>
    %8 = math.tanh %7 : vector<104x128xbf16>
    %c0_5 = arith.constant 0 : index
    %c0_6 = arith.constant 0 : index
    %9 = vector.load %arg4[%c0_5, %c0_6] : memref<128x128xbf16, #tpu.memory_space<vmem>>, vector<128x128xbf16>
    %cst_7 = arith.constant dense<0.000000e+00> : vector<104x128xf32>
    %10 = tpu.matmul %8, %9, %cst_7 {dimension_numbers = #tpu.dot_dimension_numbers<[1], [0], [0], [1], [0, 0, 1, 1], [], []>} : vector<104x128xbf16>, vector<128x128xbf16>, vector<104x128xf32> -> vector<104x128xf32>
    %c0_8 = arith.constant 0 : index
    %c0_9 = arith.constant 0 : index
    %11 = vector.load %arg5[%c0_8, %c0_9] : memref<1x128xf32, #tpu.memory_space<vmem>>, vector<1x128xf32>
    %12 = vector.broadcast %11 : vector<1x128xf32> to vector<104x128xf32>
    %13 = arith.addf %10, %12 : vector<104x128xf32>
    %14 = arith.truncf %13 : vector<104x128xf32> to vector<104x128xbf16>
    %15 = math.tanh %14 : vector<104x128xbf16>
    %c0_10 = arith.constant 0 : index
    %c0_11 = arith.constant 0 : index
    %16 = vector.load %arg6[%c0_10, %c0_11] : memref<128x128xbf16, #tpu.memory_space<vmem>>, vector<128x128xbf16>
    %cst_12 = arith.constant dense<0.000000e+00> : vector<104x128xf32>
    %17 = tpu.matmul %15, %16, %cst_12 {dimension_numbers = #tpu.dot_dimension_numbers<[1], [0], [0], [1], [0, 0, 1, 1], [], []>} : vector<104x128xbf16>, vector<128x128xbf16>, vector<104x128xf32> -> vector<104x128xf32>
    %c0_13 = arith.constant 0 : index
    %c0_14 = arith.constant 0 : index
    %18 = vector.load %arg7[%c0_13, %c0_14] : memref<1x128xf32, #tpu.memory_space<vmem>>, vector<1x128xf32>
    %19 = vector.broadcast %18 : vector<1x128xf32> to vector<104x128xf32>
    %20 = arith.addf %17, %19 : vector<104x128xf32>
    %21 = arith.truncf %20 : vector<104x128xf32> to vector<104x128xbf16>
    %c0_15 = arith.constant 0 : index
    %c0_16 = arith.constant 0 : index
    %22 = vector.load %arg8[%c0_15, %c0_16] : memref<104x128xbf16, #tpu.memory_space<vmem>>, vector<104x128xbf16>
    tpu.vector_store %arg8[%c0_15, %c0_16], %21 {strides = array<i32>} : memref<104x128xbf16, #tpu.memory_space<vmem>>, vector<104x128xbf16>,
    return
  }
  func.func @transform_0(%arg0: i32) -> (i32, i32) {
    %c0_i32 = arith.constant 0 : i32
    %c0_i32_0 = arith.constant 0 : i32
    return %arg0, %c0_i32 : i32, i32
  }
  func.func @transform_1(%arg0: i32) -> (i32, i32) {
    %c0_i32 = arith.constant 0 : i32
    %c0_i32_0 = arith.constant 0 : i32
    %c0_i32_1 = arith.constant 0 : i32
    return %c0_i32, %c0_i32_0 : i32, i32
  }
  func.func @transform_2(%arg0: i32) -> (i32, i32) {
    %c0_i32 = arith.constant 0 : i32
    %c0_i32_0 = arith.constant 0 : i32
    %c0_i32_1 = arith.constant 0 : i32
    return %c0_i32, %c0_i32_0 : i32, i32
  }
  func.func @transform_3(%arg0: i32) -> (i32, i32) {
    %c0_i32 = arith.constant 0 : i32
    %c0_i32_0 = arith.constant 0 : i32
    %c0_i32_1 = arith.constant 0 : i32
    return %c0_i32, %c0_i32_0 : i32, i32
  }
  func.func @transform_4(%arg0: i32) -> (i32, i32) {
    %c0_i32 = arith.constant 0 : i32
    %c0_i32_0 = arith.constant 0 : i32
    %c0_i32_1 = arith.constant 0 : i32
    return %c0_i32, %c0_i32_0 : i32, i32
  }
  func.func @transform_5(%arg0: i32) -> (i32, i32) {
    %c0_i32 = arith.constant 0 : i32
    %c0_i32_0 = arith.constant 0 : i32
    %c0_i32_1 = arith.constant 0 : i32
    return %c0_i32, %c0_i32_0 : i32, i32
  }
  func.func @transform_6(%arg0: i32) -> (i32, i32) {
    %c0_i32 = arith.constant 0 : i32
    %c0_i32_0 = arith.constant 0 : i32
    %c0_i32_1 = arith.constant 0 : i32
    return %c0_i32, %c0_i32_0 : i32, i32
  }
  func.func @transform_7(%arg0: i32) -> (i32, i32) {
    %c0_i32 = arith.constant 0 : i32
    %c0_i32_0 = arith.constant 0 : i32
    return %arg0, %c0_i32 : i32, i32
  }
}

</mosaic_0001>

<bundles_post_ra>
// kernel: loaded_gaussian_policy_forward.1
= control target key start
LH: loop header
LB: loop body
LE: loop exit
PB: predicated region body
PF: predicated region fallthrough
CT: control target
= control target key end

     0   :  { %s1657_s24 = smov 0   ;;  %s1659_s25 = smov 0   ;;  %s1938_s0 = inlined_call_operand.vmem [shape: f32[200,16], index: 0, kind: input, shape index: {}]   ;;  %s1939_s1 = inlined_call_operand.vmem [shape: bf16[16,128], index: 1, kind: input, shape index: {}]   ;;  %s1940_s2 = inlined_call_operand.vmem [shape: f32[1,128], index: 2, kind: input, shape index: {}]   ;;  %s1941_s3 = inlined_call_operand.vmem [shape: bf16[128,128], index: 3, kind: input, shape index: {}]   ;;  %s1942_s4 = inlined_call_operand.vmem [shape: f32[1,128], index: 4, kind: input, shape index: {}]   ;;  %s1943_s5 = inlined_call_operand.vmem [shape: bf16[128,128], index: 5, kind: input, shape index: {}]   ;;  %s1944_s6 = inlined_call_operand.vmem [shape: f32[1,128], index: 6, kind: input, shape index: {}]   ;;  %s1945_s7 = inlined_call_operand.vmem [shape: bf16[200,128], index: 7, kind: output, shape index: {}]  }
   0x1   :  { %s1661_s26 = smov 0  }
   0x2 LB: > { %s1670_s27 = sadd.s32 4294967295, %s1581_s26   ;;  %s1672_s28 = sadd.s32 1, %s1581_s26   ;;  %s1581_s26 = sphi %s1661_s26, %s1952_s26   ;;  %s1577_s25 = sphi %s1659_s25, %s1951_s25   ;;  %s1573_s24 = sphi %s1657_s24, %s1950_s24  }
   0x3   : > { %s173_s29 = ssub.s32 %s1581_s26, %s1672_s28  ;;  %s176_s30 = sadd.s32 1, %s1577_s25 }
   0x4   : > { %p174_p0 = scmp.eq.s32.totalorder %s173_s29, 0  ;;  %p186_p1 = scmp.ne.s32.totalorder %s1577_s25, %s1573_s24 }
   0x5   : > { %p187_p2 = scmp.eq.s32.totalorder %s1670_s27, 1  ;;  %p1125_p3 = scmp.ge.s32.totalorder %s1581_s26, 1 }
   0x6   : > { %s1680_s8 = scalar_select %p174_p0, %s1577_s25, %s176_s30  }
   0x7   : > { %p1682_p4 = por %p187_p2, %p186_p1  ;;  %p246_p5 = scmp.lt.s32.totalorder %s1581_s26, 3 }
   0x9   : > { %p247_p6 = pnand %p1125_p3, %p246_p5 }
   0xa   : > { %v1478_v0 = vld [vmem:[%s1939_s1] sm:$0xff] (!%p247_p6)   ;;  %v1615_v1 = vmov (!%p247_p6), 0.0   ;;  %s1691_s12 = smul.u32 (!%p247_p6), 13, %s1670_s27  ;;  %vm1616_vm0 = vmmov (!%p247_p6), 0   ;;  %vm336_vm1 = vcmask (!%p247_p6), 130048   ;;  %v1480_v13 = vld [vmem:[%s1941_s3 + $0x8] sm:$0xff] (!%p247_p6)  }
   0xb   : > { %250 = sbr.rel (%p247_p6) target bundleno = 820 (0x334), region = 48  ;;  %1266 = vmatprep.subr.bf16.mxu0 (!%p247_p6), %v1615_v1  ;;  %1384 = vmatprep.subr.bf16.mxu1 (!%p247_p6), %v1615_v1  ;;  %v1479_v8 = vld [vmem:[%s1941_s3] sm:$0xff] (!%p247_p6)   ;;  %v1481_v16 = vld [vmem:[%s1941_s3 + $0x10] sm:$0xff] (!%p247_p6)   ;;  %v1482_v25 = vld [vmem:[%s1941_s3 + $0x18] sm:$0xff] (!%p247_p6)   ;;  %s278_s22 = sand.u32 (!%p247_p6), 1, %s1573_s24  }
   0xc   : > { %1267 = vmatpush3.bf16.msra.mxu0 (!%p247_p6), %v1478_v0  ;;  %1268 = vmatprep.mubr.msk.bf16.mxu0 (!%p247_p6), %vm1616_vm0, %v1615_v1  ;;  %p286_p7 = scmp.lt.s32.totalorder (!%p247_p6), %s1691_s12, 24  ;;  %v1483_v26 = vld [vmem:[%s1941_s3 + $0x20] sm:$0xff] (!%p247_p6)   ;;  %v1484_v27 = vld [vmem:[%s1941_s3 + $0x28] sm:$0xff] (!%p247_p6)   ;;  %v1485_v28 = vld [vmem:[%s1941_s3 + $0x30] sm:$0xff] (!%p247_p6)   ;;  %s1386_s29 = smul.u32 (!%p247_p6), 52, %s278_s22 }
   0xd   : > { %1385 = vmatpush3.bf16.msra.mxu1 (!%p247_p6), %v1478_v0  ;;  %1284 = vmatprep.mubr.msk.bf16.mxu1 (!%p247_p6), %vm1616_vm0, %v1615_v1  ;;  %v1486_v29 = vld [vmem:[%s1941_s3 + $0x38] sm:$0xff] (!%p247_p6)   ;;  %v1487_v30 = vld [vmem:[%s1943_s5] sm:$0xff] (!%p247_p6)   ;;  %v1488_v31 = vld [vmem:[%s1943_s5 + $0x8] sm:$0xff] (!%p247_p6)  }
   0xe   : > { %1296 = vmatprep.subr.bf16.mxu1 (!%p247_p6), %v1615_v1  ;;  %1340 = vmatprep.subr.bf16.mxu0 (!%p247_p6), %v1615_v1  ;;  %v1489_v32 = vld [vmem:[%s1943_s5 + $0x10] sm:$0xff] (!%p247_p6)   ;;  %v1490_v33 = vld [vmem:[%s1943_s5 + $0x18] sm:$0xff] (!%p247_p6)   ;;  %v1791_v34 = vld [vmem:[%s1940_s2] ss:$0 sm:$0xff] (!%p247_p6)  ;;  %s1852_s30 = scalar_lea.vmem (!%p247_p6), [#allocation2], %s1386_s29  }
  0x12   : > { %s287_s13 = scalar_select %p286_p7, %s1691_s12, 24 }
  0x13   : > { %s866_s24 = ssub.s32 (%p1682_p4), 25, %s1691_s12  ;;  %s1192_s10 = smul.u32 (%p1682_p4), 52, %s1670_s27 }
  0x14   : > { %s1126_s14 = sshll.u32 %s287_s13, 3  ;;  %p867_p8 = scmp.lt.s32.totalorder (%p1682_p4), %s866_s24, 13 }
  0x15   : > { %s1705_s17 = scalar_lea.vmem %s1938_s0, %s1126_s14  ;;  %s1868_s14 = scalar_lea.vmem (%p1682_p4), %s1945_s7, %s1192_s10  }
  0x16   : > { %v301_v2 = vld [vmem:[%s1705_s17] sm:$0xff]  ;;  %v302_v3 = vld [vmem:[%s1705_s17 + $0x8] sm:$0xff]  ;;  %v303_v6 = vld [vmem:[%s1705_s17 + $0x10] sm:$0xff] }
  0x17   : > { %v314_v4 = vpack.c.bf16 %v302_v3, %v301_v2  ;;  %v309_v5 = vld [vmem:[%s1705_s17 + $0x40] sm:$0xff]  ;;  %v310_v7 = vld [vmem:[%s1705_s17 + $0x48] sm:$0xff]  ;;  %v304_v9 = vld [vmem:[%s1705_s17 + $0x18] sm:$0xff] }
  0x18   : > { %v318_v10 = vpack.c.bf16 %v310_v7, %v309_v5  ;;  %v311_v11 = vld [vmem:[%s1705_s17 + $0x50] sm:$0xff]  ;;  %v312_v12 = vld [vmem:[%s1705_s17 + $0x58] sm:$0xff]  ;;  %v315_v14 = vpack.c.bf16 %v304_v9, %v303_v6  ;;  %v305_v17 = vld [vmem:[%s1705_s17 + $0x20] sm:$0xff] }
  0x19   : > { %1269 = vmatmul.mubr.msk.bf16.vlgmr.msra.gmra.mrb[0].mxu0 %vm336_vm1, %v314_v4  ;;  %v319_v15 = vpack.c.bf16 %v312_v12, %v311_v11  ;;  %v306_v18 = vld [vmem:[%s1705_s17 + $0x28] sm:$0xff]  ;;  %v313_v20 = vld [vmem:[%s1705_s17 + $0x60] sm:$0xff]  ;;  %v307_v22 = vld [vmem:[%s1705_s17 + $0x30] sm:$0xff] }
  0x1a   : > { %1272 = vmatprep.mubr.msk.bf16.mxu0 %vm1616_vm0, %v1615_v1  ;;  %1285 = vmatmul.mubr.msk.bf16.vlgmr.msra.gmra.mrb[0].mxu1 %vm336_vm1, %v318_v10  ;;  %v316_v19 = vpack.c.bf16 %v306_v18, %v305_v17  ;;  %v320_v21 = vpack.c.bf16 %v313_v20, %v313_v20  ;;  %v308_v23 = vld [vmem:[%s1705_s17 + $0x38] sm:$0xff] }
  0x1b   : > { %1288 = vmatprep.mubr.msk.bf16.mxu1 %vm1616_vm0, %v1615_v1  ;;  %1297 = vmatpush3.bf16.msra.mxu1 %v1479_v8  ;;  %v317_v24 = vpack.c.bf16 %v308_v23, %v307_v22 }
  0x1c   : > { %1298 = vmatprep.subr.bf16.mxu1 %v1615_v1  ;;  %1341 = vmatpush3.bf16.msra.mxu0 %v1487_v30  ;;  %v1494_v30 = vld [vmem:[%s1943_s5 + $0x38] sm:$0xff]  }
  0x1d   : > { %1342 = vmatprep.subr.bf16.mxu0 %v1615_v1 }
  0x1f   : > { %1299 = vmatpush3.bf16.msra.mxu1 %v1480_v13 }
  0x20   : > { %1300 = vmatprep.subr.bf16.mxu1 %v1615_v1  ;;  %1343 = vmatpush3.bf16.msra.mxu0 %v1488_v31  ;;  %v1136_v31 = vld [vmem:[%s1942_s4] ss:$0 sm:$0xff] }
  0x21   : > { %1273 = vmatmul.mubr.msk.bf16.gmra.mrb[4].mxu0 %vm336_vm1, %v315_v14  ;;  %1344 = vmatprep.subr.bf16.mxu0 %v1615_v1 }
  0x22   : > { %1276 = vmatprep.mubr.msk.bf16.mxu0 %vm1616_vm0, %v1615_v1  ;;  %1289 = vmatmul.mubr.msk.bf16.gmra.mrb[4].mxu1 %vm336_vm1, %v319_v15 }
  0x23   : > { %1292 = vmatprep.mubr.msk.bf16.mxu1 %vm1616_vm0, %v1615_v1  ;;  %1301 = vmatpush3.bf16.msra.mxu1 %v1481_v16 }
  0x24   : > { %1302 = vmatprep.subr.bf16.mxu1 %v1615_v1  ;;  %1345 = vmatpush3.bf16.msra.mxu0 %v1489_v32 }
  0x25   : > { %1346 = vmatprep.subr.bf16.mxu0 %v1615_v1 }
  0x27   : > { %1303 = vmatpush3.bf16.msra.mxu1 %v1482_v25 }
  0x28   : > { %1304 = vmatprep.subr.bf16.mxu1 %v1615_v1  ;;  %1347 = vmatpush3.bf16.msra.mxu0 %v1490_v33 }
  0x29   : > { %1277 = vmatmul.mubr.msk.bf16.gmra.mrb[8].mxu0 %vm336_vm1, %v316_v19  ;;  %1348 = vmatprep.subr.bf16.mxu0 %v1615_v1 }
  0x2a   : > { %1280 = vmatprep.mubr.msk.bf16.mxu0 %vm1616_vm0, %v1615_v1  ;;  %1293 = vmatmul.mubr.msk.bf16.gmra.mrb[8].mxu1 %vm336_vm1, %v320_v21 }
  0x2b   : > { %1312 = vmatprep.mubr.msk.bf16.mxu1 %vm1616_vm0, %v1615_v1  ;;  %1305 = vmatpush3.bf16.msra.mxu1 %v1483_v26 }
  0x2c   : > { %1306 = vmatprep.subr.bf16.mxu1 %v1615_v1 }
  0x2f   : > { %1307 = vmatpush3.bf16.msra.mxu1 %v1484_v27  ;;  %v1491_v27 = vld [vmem:[%s1943_s5 + $0x20] sm:$0xff]  }
  0x30   : > { %1308 = vmatprep.subr.bf16.mxu1 %v1615_v1  ;;  %1349 = vmatpush3.bf16.msra.mxu0 %v1491_v27 }
  0x31   : > { %1281 = vmatmul.mubr.msk.bf16.gmra.mrb[12].mxu0 %vm336_vm1, %v317_v24  ;;  %1350 = vmatprep.subr.bf16.mxu0 %v1615_v1 }
  0x32   : > { %1356 = vmatprep.mubr.msk.bf16.mxu0 %vm1616_vm0, %v1615_v1 }
  0x33   : > { %1309 = vmatpush3.bf16.msra.mxu1 %v1485_v28  ;;  %v1492_v28 = vld [vmem:[%s1943_s5 + $0x28] sm:$0xff]  }
  0x34   : > { %1310 = vmatprep.subr.bf16.mxu1 %v1615_v1  ;;  %1351 = vmatpush3.bf16.msra.mxu0 %v1492_v28 }
  0x35   : > { %1352 = vmatprep.subr.bf16.mxu0 %v1615_v1 }
  0x37   : > { %1311 = vmatpush3.bf16.msra.mxu1 %v1486_v29  ;;  %v1493_v29 = vld [vmem:[%s1943_s5 + $0x30] sm:$0xff]  }
  0x38   : > { %1353 = vmatpush3.bf16.msra.mxu0 %v1493_v29 }
  0x39   : > { %1354 = vmatprep.subr.bf16.mxu0 %v1615_v1 }
  0x3c   : > { %1355 = vmatpush3.bf16.msra.mxu0 %v1494_v30 }
  0xec   : > { %v392_v35 = vpop.f32.mrb[0].mxu0 }
  0xed   : > { %v1270_v36 = vpop.f32.mrb[1].mxu0  ;;  %v393_v38 = vadd.f32 %v1791_v34, %v392_v35  ;;  %v424_v41 = vpop.f32.mrb[0].mxu1 }
  0xee   : > { %v395_v37 = vpop.f32.mrb[2].mxu0  ;;  %v425_v42 = vadd.f32 %v1791_v34, %v424_v41  ;;  %v1286_v43 = vpop.f32.mrb[1].mxu1 }
  0xef   : > { %v396_v39 = vadd.f32 %v1791_v34, %v395_v37  ;;  %v1271_v40 = vpop.f32.mrb[3].mxu0  ;;  %v427_v45 = vpop.f32.mrb[2].mxu1 }
  0xf0   : > { %v428_v46 = vadd.f32 %v1791_v34, %v427_v45  ;;  %v1287_v47 = vpop.f32.mrb[3].mxu1 }
  0xf1   : > { %v446_v44 = vpack.c.bf16 %v396_v39, %v393_v38 }
  0xf2   : > { %v450_v49 = vpack.c.bf16 %v428_v46, %v425_v42 }
  0xf3   : > { %1495 = vtanh.bf16 %v446_v44 }
  0xf4   : > { %v400_v48 = vpop.f32.mrb[4].mxu0 }
  0xf5   : > { %v1274_v50 = vpop.f32.mrb[5].mxu0  ;;  %v401_v52 = vadd.f32 %v1791_v34, %v400_v48  ;;  %v432_v55 = vpop.f32.mrb[4].mxu1 }
  0xf6   : > { %v403_v51 = vpop.f32.mrb[6].mxu0  ;;  %v433_v56 = vadd.f32 %v1791_v34, %v432_v55  ;;  %v1290_v57 = vpop.f32.mrb[5].mxu1 }
  0xf7   : > { %v404_v53 = vadd.f32 %v1791_v34, %v403_v51  ;;  %v1275_v54 = vpop.f32.mrb[7].mxu0  ;;  %v435_v59 = vpop.f32.mrb[6].mxu1 }
  0xf8   : > { %v436_v60 = vadd.f32 %v1791_v34, %v435_v59  ;;  %v1291_v61 = vpop.f32.mrb[7].mxu1 }
  0xf9   : > { %v447_v58 = vpack.c.bf16 %v404_v53, %v401_v52 }
  0xfa   : > { %v451_v63 = vpack.c.bf16 %v436_v60, %v433_v56 }
  0xfb   : > { %1497 = vtanh.bf16 %v447_v58 }
  0xfc   : > { %v408_v62 = vpop.f32.mrb[8].mxu0 }
  0xfd   : > { %v1278_v0 = vpop.f32.mrb[9].mxu0  ;;  %v409_v4 = vadd.f32 %v1791_v34, %v408_v62  ;;  %v440_v7 = vpop.f32.mrb[8].mxu1 }
  0xfe   : > { %v1496_v2 = vpop.eup %1495  ;;  %v411_v3 = vpop.f32.mrb[10].mxu0  ;;  %v441_v22 = vadd.f32 %v1791_v34, %v440_v7 }
  0xff   : > { %v412_v5 = vadd.f32 %v1791_v34, %v411_v3  ;;  %v1279_v6 = vpop.f32.mrb[11].mxu0  ;;  %1313 = vmatmul.mubr.bf16.vlgmr.msra.gmra.mrb[12].mxu1 %v1496_v2  ;;  %v1294_v8 = vpop.f32.mrb[9].mxu1 }
 0x100   : > { %1316 = vmatprep.mubr.msk.bf16.mxu1 %vm1616_vm0, %v1615_v1  ;;  %v443_v10 = vpop.f32.mrb[10].mxu1  ;;  %v452_v23 = vpack.c.bf16 %v441_v22, %v441_v22 }
 0x101   : > { %v448_v9 = vpack.c.bf16 %v412_v5, %v409_v4  ;;  %v1295_v11 = vpop.f32.mrb[11].mxu1 }
 0x103   : > { %1499 = vtanh.bf16 %v448_v9 }
 0x104   : > { %v416_v12 = vpop.f32.mrb[12].mxu0 }
 0x105   : > { %v1282_v13 = vpop.f32.mrb[13].mxu0  ;;  %v417_v16 = vadd.f32 %v1791_v34, %v416_v12 }
 0x106   : > { %v1498_v14 = vpop.eup %1497  ;;  %v419_v15 = vpop.f32.mrb[14].mxu0 }
 0x107   : > { %v420_v17 = vadd.f32 %v1791_v34, %v419_v15  ;;  %v1283_v18 = vpop.f32.mrb[15].mxu0  ;;  %1317 = vmatmul.mubr.bf16.gmra.mrb[16].mxu1 %v1498_v14 }
 0x108   : > { %1320 = vmatprep.mubr.msk.bf16.mxu1 %vm1616_vm0, %v1615_v1 }
 0x109   : > { %v449_v19 = vpack.c.bf16 %v420_v17, %v417_v16 }
 0x10b   : > { %1501 = vtanh.bf16 %v449_v19 }
 0x10c   : > { %1503 = vtanh.bf16 %v450_v49 }
 0x10d   : > { %1505 = vtanh.bf16 %v451_v63 }
 0x10e   : > { %v1500_v20 = vpop.eup %1499  ;;  %1507 = vtanh.bf16 %v452_v23 }
 0x10f   : > { %1321 = vmatmul.mubr.bf16.gmra.mrb[20].mxu1 %v1500_v20 }
 0x110   : > { %1324 = vmatprep.mubr.msk.bf16.mxu1 %vm1616_vm0, %v1615_v1 }
 0x116   : > { %v1502_v21 = vpop.eup %1501 }
 0x117   : > { %1325 = vmatmul.mubr.bf16.gmra.mrb[24].mxu1 %v1502_v21  ;;  %v1504_v24 = vpop.eup %1503 }
 0x118   : > { %1328 = vmatprep.mubr.msk.bf16.mxu1 %vm1616_vm0, %v1615_v1  ;;  %v1506_v25 = vpop.eup %1505 }
 0x119   : > { %v1508_v26 = vpop.eup %1507 }
 0x11f   : > { %1329 = vmatmul.mubr.bf16.gmra.mrb[28].mxu1 %v1504_v24  ;;  %v1145_v24 = vld [vmem:[%s1944_s6] ss:$0 sm:$0xff] }
 0x120   : > { %1332 = vmatprep.mubr.msk.bf16.mxu1 %vm1616_vm0, %v1615_v1 }
 0x127   : > { %1333 = vmatmul.mubr.bf16.gmra.mrb[32].mxu1 %v1506_v25 }
 0x128   : > { %1336 = vmatprep.mubr.msk.bf16.mxu1 %vm1616_vm0, %v1615_v1 }
 0x12f   : > { %1337 = vmatmul.mubr.bf16.gmra.mrb[36].mxu1 %v1508_v26 }
 0x1d2   : > { %v565_v32 = vpop.f32.mrb[12].mxu1 }
 0x1d3   : > { %v1314_v33 = vpop.f32.mrb[13].mxu1  ;;  %v566_v35 = vadd.f32 %v1136_v31, %v565_v32 }
 0x1d4   : > { %v568_v34 = vpop.f32.mrb[14].mxu1 }
 0x1d5   : > { %v569_v36 = vadd.f32 %v1136_v31, %v568_v34  ;;  %v1315_v37 = vpop.f32.mrb[15].mxu1 }
 0x1d7   : > { %v619_v38 = vpack.c.bf16 %v569_v36, %v566_v35 }
 0x1d9   : > { %1509 = vtanh.bf16 %v619_v38 }
 0x1da   : > { %v573_v39 = vpop.f32.mrb[16].mxu1 }
 0x1db   : > { %v1318_v40 = vpop.f32.mrb[17].mxu1  ;;  %v574_v42 = vadd.f32 %v1136_v31, %v573_v39 }
 0x1dc   : > { %v576_v41 = vpop.f32.mrb[18].mxu1 }
 0x1dd   : > { %v577_v43 = vadd.f32 %v1136_v31, %v576_v41  ;;  %v1319_v44 = vpop.f32.mrb[19].mxu1 }
 0x1df   : > { %v620_v45 = vpack.c.bf16 %v577_v43, %v574_v42 }
 0x1e1   : > { %1511 = vtanh.bf16 %v620_v45 }
 0x1e2   : > { %v581_v46 = vpop.f32.mrb[20].mxu1 }
 0x1e3   : > { %v1322_v47 = vpop.f32.mrb[21].mxu1  ;;  %v582_v50 = vadd.f32 %v1136_v31, %v581_v46 }
 0x1e4   : > { %v1510_v48 = vpop.eup %1509  ;;  %v584_v49 = vpop.f32.mrb[22].mxu1 }
 0x1e5   : > { %v585_v51 = vadd.f32 %v1136_v31, %v584_v49  ;;  %v1323_v52 = vpop.f32.mrb[23].mxu1  ;;  %1357 = vmatmul.mubr.bf16.vlgmr.msra.gmra.mrb[16].mxu0 %v1510_v48 }
 0x1e6   : > { %1360 = vmatprep.mubr.msk.bf16.mxu0 %vm1616_vm0, %v1615_v1 }
 0x1e7   : > { %v621_v53 = vpack.c.bf16 %v585_v51, %v582_v50 }
 0x1e9   : > { %1513 = vtanh.bf16 %v621_v53 }
 0x1ea   : > { %v589_v54 = vpop.f32.mrb[24].mxu1 }
 0x1eb   : > { %v1326_v55 = vpop.f32.mrb[25].mxu1  ;;  %v590_v58 = vadd.f32 %v1136_v31, %v589_v54 }
 0x1ec   : > { %v1512_v56 = vpop.eup %1511  ;;  %v592_v57 = vpop.f32.mrb[26].mxu1 }
 0x1ed   : > { %v593_v59 = vadd.f32 %v1136_v31, %v592_v57  ;;  %v1327_v60 = vpop.f32.mrb[27].mxu1  ;;  %1361 = vmatmul.mubr.bf16.gmra.mrb[20].mxu0 %v1512_v56 }
 0x1ee   : > { %1364 = vmatprep.mubr.msk.bf16.mxu0 %vm1616_vm0, %v1615_v1 }
 0x1ef   : > { %v622_v61 = vpack.c.bf16 %v593_v59, %v590_v58 }
 0x1f1   : > { %1515 = vtanh.bf16 %v622_v61 }
 0x1f2   : > { %v597_v62 = vpop.f32.mrb[28].mxu1 }
 0x1f3   : > { %v1330_v63 = vpop.f32.mrb[29].mxu1  ;;  %v598_v3 = vadd.f32 %v1136_v31, %v597_v62 }
 0x1f4   : > { %v1514_v0 = vpop.eup %1513  ;;  %v600_v2 = vpop.f32.mrb[30].mxu1 }
 0x1f5   : > { %v601_v4 = vadd.f32 %v1136_v31, %v600_v2  ;;  %v1331_v5 = vpop.f32.mrb[31].mxu1  ;;  %1365 = vmatmul.mubr.bf16.gmra.mrb[24].mxu0 %v1514_v0 }
 0x1f6   : > { %1368 = vmatprep.mubr.msk.bf16.mxu0 %vm1616_vm0, %v1615_v1 }
 0x1f7   : > { %v623_v6 = vpack.c.bf16 %v601_v4, %v598_v3 }
 0x1f9   : > { %1517 = vtanh.bf16 %v623_v6 }
 0x1fa   : > { %v605_v7 = vpop.f32.mrb[32].mxu1 }
 0x1fb   : > { %v1334_v8 = vpop.f32.mrb[33].mxu1  ;;  %v606_v11 = vadd.f32 %v1136_v31, %v605_v7 }
 0x1fc   : > { %v1516_v9 = vpop.eup %1515  ;;  %v608_v10 = vpop.f32.mrb[34].mxu1 }
 0x1fd   : > { %v609_v12 = vadd.f32 %v1136_v31, %v608_v10  ;;  %v1335_v13 = vpop.f32.mrb[35].mxu1  ;;  %1369 = vmatmul.mubr.bf16.gmra.mrb[28].mxu0 %v1516_v9 }
 0x1fe   : > { %1372 = vmatprep.mubr.msk.bf16.mxu0 %vm1616_vm0, %v1615_v1 }
 0x1ff   : > { %v624_v14 = vpack.c.bf16 %v609_v12, %v606_v11 }
 0x201   : > { %1519 = vtanh.bf16 %v624_v14 }
 0x202   : > { %v613_v15 = vpop.f32.mrb[36].mxu1 }
 0x203   : > { %v614_v16 = vadd.f32 %v1136_v31, %v613_v15  ;;  %v1338_v17 = vpop.f32.mrb[37].mxu1 }
 0x204   : > { %v1518_v18 = vpop.eup %1517  ;;  %v616_v19 = vpop.f32.mrb[38].mxu1 }
 0x205   : > { %v625_v20 = vpack.c.bf16 %v614_v16, %v614_v16  ;;  %v1339_v21 = vpop.f32.mrb[39].mxu1  ;;  %1373 = vmatmul.mubr.bf16.gmra.mrb[32].mxu0 %v1518_v18 }
 0x206   : > { %1376 = vmatprep.mubr.msk.bf16.mxu0 %vm1616_vm0, %v1615_v1 }
 0x207   : > { %1521 = vtanh.bf16 %v625_v20 }
 0x20c   : > { %v1520_v22 = vpop.eup %1519 }
 0x20d   : > { %1377 = vmatmul.mubr.bf16.gmra.mrb[36].mxu0 %v1520_v22 }
 0x20e   : > { %1380 = vmatprep.mubr.msk.bf16.mxu0 %vm1616_vm0, %v1615_v1 }
 0x212   : > { %v1522_v23 = vpop.eup %1521 }
 0x215   : > { %1381 = vmatmul.mubr.bf16.gmra.mrb[40].mxu0 %v1522_v23 }
 0x2b8   : > { %v738_v25 = vpop.f32.mrb[16].mxu0 }
 0x2b9   : > { %v1358_v26 = vpop.f32.mrb[17].mxu0  ;;  %v739_v28 = vadd.f32 %v1145_v24, %v738_v25 }
 0x2ba   : > { %v741_v27 = vpop.f32.mrb[18].mxu0 }
 0x2bb   : > { %v742_v29 = vadd.f32 %v1145_v24, %v741_v27  ;;  %v1359_v30 = vpop.f32.mrb[19].mxu0 }
 0x2bd   : > { %v1196_v31 = vpack.c.bf16 %v742_v29, %v739_v28 }
 0x2bf   : > { %1197 = vst [vmem:[%s1852_s30] sm:$0xff] %v1196_v31  }
 0x2c0   : > { %v746_v1 = vpop.f32.mrb[20].mxu0 }
 0x2c1   : > { %v1362_v32 = vpop.f32.mrb[21].mxu0  ;;  %v747_v34 = vadd.f32 %v1145_v24, %v746_v1 }
 0x2c2   : > { %v749_v33 = vpop.f32.mrb[22].mxu0 }
 0x2c3   : > { %v750_v35 = vadd.f32 %v1145_v24, %v749_v33  ;;  %v1363_v36 = vpop.f32.mrb[23].mxu0 }
 0x2c5   : > { %v1201_v37 = vpack.c.bf16 %v750_v35, %v747_v34 }
 0x2c7   : > { %1223 = vst [vmem:[%s1852_s30 + $0x8] sm:$0xff] %v1201_v37  }
 0x2c8   : > { %v754_v38 = vpop.f32.mrb[24].mxu0 }
 0x2c9   : > { %v1366_v39 = vpop.f32.mrb[25].mxu0  ;;  %v755_v41 = vadd.f32 %v1145_v24, %v754_v38 }
 0x2ca   : > { %v757_v40 = vpop.f32.mrb[26].mxu0 }
 0x2cb   : > { %v758_v42 = vadd.f32 %v1145_v24, %v757_v40  ;;  %v1367_v43 = vpop.f32.mrb[27].mxu0 }
 0x2cd   : > { %v1206_v44 = vpack.c.bf16 %v758_v42, %v755_v41 }
 0x2cf   : > { %1224 = vst [vmem:[%s1852_s30 + $0x10] sm:$0xff] %v1206_v44  }
 0x2d0   : > { %v762_v45 = vpop.f32.mrb[28].mxu0 }
 0x2d1   : > { %v1370_v46 = vpop.f32.mrb[29].mxu0  ;;  %v763_v48 = vadd.f32 %v1145_v24, %v762_v45 }
 0x2d2   : > { %v765_v47 = vpop.f32.mrb[30].mxu0 }
 0x2d3   : > { %v766_v49 = vadd.f32 %v1145_v24, %v765_v47  ;;  %v1371_v50 = vpop.f32.mrb[31].mxu0 }
 0x2d5   : > { %v1211_v51 = vpack.c.bf16 %v766_v49, %v763_v48 }
 0x2d7   : > { %1225 = vst [vmem:[%s1852_s30 + $0x18] sm:$0xff] %v1211_v51  }
 0x2d8   : > { %v770_v52 = vpop.f32.mrb[32].mxu0 }
 0x2d9   : > { %v1374_v53 = vpop.f32.mrb[33].mxu0  ;;  %v771_v55 = vadd.f32 %v1145_v24, %v770_v52 }
 0x2da   : > { %v773_v54 = vpop.f32.mrb[34].mxu0 }
 0x2db   : > { %v774_v56 = vadd.f32 %v1145_v24, %v773_v54  ;;  %v1375_v57 = vpop.f32.mrb[35].mxu0 }
 0x2dd   : > { %v1216_v58 = vpack.c.bf16 %v774_v56, %v771_v55 }
 0x2df   : > { %1226 = vst [vmem:[%s1852_s30 + $0x20] sm:$0xff] %v1216_v58  }
 0x2e0   : > { %v778_v59 = vpop.f32.mrb[36].mxu0 }
 0x2e1   : > { %v1378_v60 = vpop.f32.mrb[37].mxu0  ;;  %v779_v62 = vadd.f32 %v1145_v24, %v778_v59 }
 0x2e2   : > { %v781_v61 = vpop.f32.mrb[38].mxu0 }
 0x2e3   : > { %v782_v63 = vadd.f32 %v1145_v24, %v781_v61  ;;  %v1379_v0 = vpop.f32.mrb[39].mxu0 }
 0x2e5   : > { %v1221_v2 = vpack.c.bf16 %v782_v63, %v779_v62 }
 0x2e7   : > { %1227 = vst [vmem:[%s1852_s30 + $0x28] sm:$0xff] %v1221_v2   ;;  %864 = sbr.rel (!%p1682_p4) target bundleno = 820 (0x334), region = 52 }
 0x2e8   : > { %v786_v3 = vpop.f32.mrb[40].mxu0 }
 0x2e9   : > { %v787_v4 = vadd.f32 %v1145_v24, %v786_v3  ;;  %v1382_v5 = vpop.f32.mrb[41].mxu0 }
 0x2ea   : > { %v789_v6 = vpop.f32.mrb[42].mxu0 }
 0x2eb   : > { %v1191_v7 = vpack.c.bf16 %v787_v4, %v787_v4  ;;  %v1383_v8 = vpop.f32.mrb[43].mxu0 }
 0x2ed   : > { %857 = vst [vmem:[%s1852_s30 + $0x30] sm:$0xf] %v1191_v7 }
 0x2ee   : > { %s1954_s24 = smov (!%p867_p8, %s866_s24), 13 }
 0x2ef   : > { %s1167_s15 = sshll.u32 %s1954_s24, 6 }
 0x2f0   : > { %p1170_p9 = scmp.eq.s32.totalorder %s1167_s15, 0 }
 0x2f1   : > { %1523 = sdivrem.u32 (!%p1170_p9), %s1954_s24, 13 }
 0x2f2   : > { %875 = sbr.rel (%p1170_p9) target bundleno = 820 (0x334), region = 56 }
 0x2fa   : > { %s1874_s9 = spop.drf %1523 }
 0x2fb   : > { %p1171_p10 = scmp.le.s32.totalorder %s1874_s9, 0 }
 0x2fc   : > { %s1947_s27 = smov (!%p1171_p10), %s1868_s14  ;;  %s1948_s12 = smov (!%p1171_p10), %s1852_s30 }
 0x2fd   : > { %1078 = sbr.rel (%p1171_p10) target bundleno = 791 (0x317), region = 128  ;;  %s1883_s16 = smov (!%p1171_p10), 0  }
 0x2fe   : > { %s1885_s17 = smov (!%p1171_p10), 0  }
 0x304 LB: >> { %v892_v9 = vld [vmem:[%s1589_s12] sm:$0xf]  ;;  %v894_v10 = vld [vmem:[%s1589_s12 + $0x4] sm:$0xf]  ;;  %v896_v11 = vld [vmem:[%s1589_s12 + $0x8] sm:$0xf]  ;;  %s1597_s17 = sphi %s1885_s17, %s886_s17   ;;  %s1593_s16 = sphi %s1883_s16, %s1949_s16   ;;  %s1589_s12 = sphi %s1948_s12, %s923_s12   ;;  %s1585_s27 = sphi %s1947_s27, %s924_s27  }
 0x305   : >> { %893 = vst [vmem:[%s1585_s27] sm:$0xf] %v892_v9  ;;  %895 = vst [vmem:[%s1585_s27 + $0x4] sm:$0xf] %v894_v10  ;;  %v898_v12 = vld [vmem:[%s1589_s12 + $0xc] sm:$0xf]  ;;  %s918_s18 = sadd.s32 1, %s1593_s16 }
 0x306   : >> { %897 = vst [vmem:[%s1585_s27 + $0x8] sm:$0xf] %v896_v11  ;;  %v900_v13 = vld [vmem:[%s1589_s12 + $0x10] sm:$0xf]  ;;  %v902_v14 = vld [vmem:[%s1589_s12 + $0x14] sm:$0xf]  ;;  %p919_p11 = scmp.ge.s32.totalorder %s918_s18, %s1874_s9 }
 0x307   : >> { %899 = vst [vmem:[%s1585_s27 + $0xc] sm:$0xf] %v898_v12  ;;  %901 = vst [vmem:[%s1585_s27 + $0x10] sm:$0xf] %v900_v13  ;;  %v904_v15 = vld [vmem:[%s1589_s12 + $0x18] sm:$0xf] }
 0x308   : >> { %903 = vst [vmem:[%s1585_s27 + $0x14] sm:$0xf] %v902_v14  ;;  %v906_v16 = vld [vmem:[%s1589_s12 + $0x1c] sm:$0xf]  ;;  %v908_v17 = vld [vmem:[%s1589_s12 + $0x20] sm:$0xf] }
 0x309   : >> { %905 = vst [vmem:[%s1585_s27 + $0x18] sm:$0xf] %v904_v15  ;;  %907 = vst [vmem:[%s1585_s27 + $0x1c] sm:$0xf] %v906_v16  ;;  %v910_v18 = vld [vmem:[%s1589_s12 + $0x24] sm:$0xf] }
 0x30a   : >> { %909 = vst [vmem:[%s1585_s27 + $0x20] sm:$0xf] %v908_v17  ;;  %v912_v19 = vld [vmem:[%s1589_s12 + $0x28] sm:$0xf]  ;;  %v914_v20 = vld [vmem:[%s1589_s12 + $0x2c] sm:$0xf] }
 0x30b   : >> { %911 = vst [vmem:[%s1585_s27 + $0x24] sm:$0xf] %v910_v18  ;;  %913 = vst [vmem:[%s1585_s27 + $0x28] sm:$0xf] %v912_v19  ;;  %v916_v21 = vld [vmem:[%s1589_s12 + $0x30] sm:$0xf] }
 0x30c   : >> { %915 = vst [vmem:[%s1585_s27 + $0x2c] sm:$0xf] %v914_v20  ;;  %917 = vst [vmem:[%s1585_s27 + $0x30] sm:$0xf] %v916_v21  ;;  %s1956_s18 = smov (%p919_p11, %s918_s18), 0  ;;  %s886_s17 = sadd.s32 1, %s1597_s17  }
 0x30d   : >> { %s921_s19 = smul.u32 52, %s1956_s18  ;;  %p885_p12 = scmp.ge.s32.totalorder %s886_s17, %s1874_s9 }
 0x30e   : >> { %s1949_s16 = smov %s1956_s18 }
 0x30f   : >> { %s923_s12 = scalar_lea.vmem %s1852_s30, %s921_s19 [#allocation2]   ;;  %s924_s27 = scalar_lea.vmem %s1868_s14, %s921_s19  }
 0x310   : > { %888 = sbr.rel (!%p885_p12) target bundleno = 772 (0x304), region = 134 }
 0x317 PF: > { %1525 = sdivrem.u32 %s1954_s24, 13 }
 0x318   : > { %s1172_s20 = smul.u32 52, %s1874_s9 }
 0x31a   : > { %s929_s21 = scalar_lea.vmem %s1852_s30, %s1172_s20 [#allocation2]   ;;  %s931_s22 = scalar_lea.vmem %s1868_s14, %s1172_s20  }
 0x320   : > { %s1526_s23 = spop.drf %1525 }
 0x321   : > { %p1174_p13 = scmp.le.s32.totalorder %s1526_s23, 0 }
 0x322   : > { %s1599_s26 = smov (!%p1174_p13), %s931_s22   ;;  %s1603_s29 = smov (!%p1174_p13), %s929_s21  }
 0x323   : > { %1092 = sbr.rel (%p1174_p13) target bundleno = 820 (0x334), region = 139  ;;  %s1607_s10 = smov (!%p1174_p13), 0  }
 0x324   : > { %s1611_s11 = smov (!%p1174_p13), 0  }
 0x32a LB: >> { %v941_v22 = vld [vmem:[%s1605_s29] sm:$0xf]  ;;  %s943_s13 = sadd.s32 1, %s1609_s10  ;;  %s935_s11 = sadd.s32 1, %s1613_s11   ;;  %s1613_s11 = sphi %s1611_s11, %s935_s11   ;;  %s1609_s10 = sphi %s1607_s10, %s1608_s10   ;;  %s1605_s29 = sphi %s1603_s29, %s948_s29   ;;  %s1601_s26 = sphi %s1599_s26, %s949_s26  }
 0x32b   : >> { %942 = vst [vmem:[%s1601_s26] sm:$0xf] %v941_v22  ;;  %p944_p0 = scmp.ge.s32.totalorder %s943_s13, %s1526_s23  ;;  %p934_p1 = scmp.ge.s32.totalorder %s935_s11, %s1526_s23 }
 0x32d   : >> { %s1958_s13 = smov (%p944_p0, %s943_s13), 0  ;;  %937 = sbr.rel (!%p934_p1) target bundleno = 810 (0x32a), region = 145 }
 0x32e   : >> { %s1175_s30 = sshll.u32 %s1958_s13, 2  ;;  %s1608_s10 = smov %s1958_s13  }
 0x32f   : >> { %s948_s29 = scalar_lea.vmem %s929_s21, %s1175_s30 [#allocation2]   ;;  %s949_s26 = scalar_lea.vmem %s931_s22, %s1175_s30  }
 0x334 PF: > { %p14_p2 = scmp.ge.s32.totalorder %s1672_s28, 4   ;;  %s1950_s24 = smov %s1577_s25 }
 0x335   : > { %s1951_s25 = smov %s1680_s8  ;;  %s1952_s26 = smov %s1672_s28 }
 0x336   :  { %16 = sbr.rel (!%p14_p2) target bundleno = 2 (0x2), region = 156 }

</bundles_post_ra>
